<compile_context>
chip_gen: v7x
topology: tpu7x:2x2x1
jax: 0.10.0
libtpu: 0.0.40
codegen_flags: <defaults>
</compile_context>

<pallas_src>
import math

import jax
import jax.numpy as jnp
from jax.experimental import pallas as pl
from jax.experimental.pallas import tpu as pltpu


_LANE = 128
_SUBLANE = 8
_SOFT_MAX_TILE_ROWS = 8192              # big tiles amortize ~0.35us/step grid overhead
_MAX_PACKED_M_BYTES = 8 * 1024 * 1024   # cap on the resident block-diagonal interp matrix


def _round_up(x: int, m: int) -> int:
    return ((x + m - 1) // m) * m


def _vmem_budget():
    """Generation-aware VMEM sizing: (tile budget, scoped vmem_limit_bytes)."""
    try:
        cap = int(pltpu.get_tpu_info().vmem_capacity_bytes)
    except Exception:
        cap = 64 * 1024 * 1024          # conservative fallback (v7x per-core VMEM)
    cap = min(cap, 128 * 1024 * 1024)
    limit = int(cap * 0.75)             # scoped VMEM requested from the compiler
    budget = int(cap * 0.55)            # what tiles are sized against (scratch headroom)
    return budget, limit


def _linear_interp_matrix(w_in: int, w_out: int) -> jnp.ndarray:
    """(w_in, w_out) f32 matrix M such that `x @ M` reproduces PyTorch
    F.interpolate(mode='bilinear', align_corners=False, antialias=False) along
    the last axis (H unchanged => identity along H)."""
    j = jnp.arange(w_out, dtype=jnp.float32)
    scale = float(w_in) / float(w_out)
    src = jnp.maximum((j + 0.5) * scale - 0.5, 0.0)   # PyTorch clamps negative src to 0
    x0 = jnp.minimum(jnp.floor(src).astype(jnp.int32), w_in - 1)
    x1 = jnp.minimum(x0 + 1, w_in - 1)
    lam = src - x0.astype(jnp.float32)
    rows = jnp.arange(w_in, dtype=jnp.int32)[:, None]
    # When x0 == x1 (right boundary) both terms land on the same row -> weight 1.
    m = ((rows == x0[None, :]).astype(jnp.float32) * (1.0 - lam)[None, :]
         + (rows == x1[None, :]).astype(jnp.float32) * lam[None, :])
    return m


def _choose_group(rows: int, w_in: int, w_out: int) -> int:
    """Row-group size G: pack G consecutive rows into the lane dimension so the
    packed input (G*w_in) and output (G*w_out) last dims are multiples of 128
    (lane-dense loads/stores, no pad traffic).  Falls back when rows is not
    divisible by G or the block-diagonal matrix would be too large."""
    g_in = _LANE // math.gcd(w_in, _LANE)
    g_out = _LANE // math.gcd(w_out, _LANE)
    g_both = g_in * g_out // math.gcd(g_in, g_out)
    for g in (g_both, g_out):
        if rows % g:
            continue
        if (g * w_in) * (g * w_out) * 4 > _MAX_PACKED_M_BYTES:
            continue
        return g
    return 1


def _choose_tile_rows(rows_packed: int, k: int, n: int, x_bytes: int, budget: int) -> int:
    """Largest row tile (multiple of the dtype's sublane quantum) whose
    double-buffered input+output tiles plus the resident interp matrix fit the
    VMEM budget, using lane/sublane-padded extents.  Capped for grid-overhead
    amortization and to keep >= 2 grid steps (v7x megacore sharding)."""
    sub = _SUBLANE * max(1, 4 // x_bytes)             # 8 (f32) / 16 (bf16) / 32 (int8)
    k_pad = _round_up(k, _LANE)
    n_pad = _round_up(n, _LANE)
    m_bytes = _round_up(k, _SUBLANE) * n_pad * 4      # f32 interp matrix VMEM footprint
    per_row = 2 * (k_pad + n_pad) * x_bytes           # double-buffered input + output tiles
    avail = budget - 2 * m_bytes                      # matrix conservatively counted x2
    if avail > per_row * sub:
        cap = (avail // per_row) // sub * sub
    else:
        cap = sub
    cap = min(cap, _SOFT_MAX_TILE_ROWS)
    # Keep at least 2 grid steps so v7x's two TensorCores both get work
    # (harmless single extra step on v5e/v6e).
    half = _round_up(pl.cdiv(rows_packed, 2), sub)
    tile = max(sub, min(cap, half))
    if tile >= rows_packed:
        tile = rows_packed                            # single full-extent block is allowed
    return int(tile)


def _interp_matmul_kernel(x_ref, w_ref, o_ref):
    # [tile_r, K] @ [K, Nout] on the MXU, f32 accumulation, cast on store.
    x = x_ref[...].astype(jnp.float32)
    o_ref[...] = jnp.dot(x, w_ref[...], preferred_element_type=jnp.float32).astype(o_ref.dtype)


def interplote_align_head_forward(seg_score, labels, mask=None):
    """JAX/Pallas equivalent of InterploteAlignHead.forward.

    seg_score: [N, C, H, W_in]   (NCHW, matching the PyTorch module)
    labels:    [..., W_out]      (only its last-dim size is used)
    mask:      unused (matches the PyTorch forward, which ignores it)
    """
    N, C, H, W_in = seg_score.shape
    W_out = int(labels.shape[-1])
    rows = N * C * H
    out_dtype = seg_score.dtype
    x_bytes = jnp.dtype(out_dtype).itemsize

    # Row-group packing (lane-dense, zero pad bytes, no post-kernel slice).
    G = _choose_group(rows, W_in, W_out)
    K = G * W_in
    Nout = G * W_out
    rows_packed = rows // G

    # Interp weights stay f32 (PyTorch interpolates internally in fp32).
    base = _linear_interp_matrix(W_in, W_out)
    M = jnp.kron(jnp.eye(G, dtype=jnp.float32), base) if G > 1 else base  # block-diagonal

    budget, vmem_limit = _vmem_budget()
    tile_r = _choose_tile_rows(rows_packed, K, Nout, x_bytes, budget)
    num_tiles = pl.cdiv(rows_packed, tile_r)  # partial last block: Pallas masks the stores

    x2d = seg_score.reshape(rows_packed, K)   # free contiguous reshape, no padding pass

    cost = pl.CostEstimate(
        flops=2 * rows_packed * K * Nout,
        transcendentals=0,
        bytes_accessed=rows_packed * (K + Nout) * x_bytes + K * Nout * 4,
    )

    out2d = pl.pallas_call(
        _interp_matmul_kernel,
        out_shape=jax.ShapeDtypeStruct((rows_packed, Nout), out_dtype),
        grid=(num_tiles,),
        in_specs=[
            # Row tiles stream through the auto double-buffered pipeline.
            pl.BlockSpec((tile_r, K), lambda i: (i, 0)),
            # Constant block index -> interp matrix stays resident in VMEM.
            pl.BlockSpec((K, Nout), lambda i: (0, 0)),
        ],
        out_specs=pl.BlockSpec((tile_r, Nout), lambda i: (i, 0)),
        compiler_params=pltpu.CompilerParams(
            dimension_semantics=("parallel",),      # independent row tiles -> megacore
            vmem_limit_bytes=vmem_limit,
        ),
        cost_estimate=cost,
    )(x2d, M)
    # TODO(synk): for very large W_in/W_out add a banded grid axis over W_out
    # (each 128-column output tile only touches ~ceil(128*W_in/W_out)+2 input
    # columns) so the interp matrix never has to be resident and FLOPs stay
    # O(2) per output element instead of O(W_in).

    return out2d.reshape(N, C, H, W_out)      # free contiguous reshape


if __name__ == "__main__":
    key = jax.random.PRNGKey(0)
    k1, k2 = jax.random.split(key)

    # Small shapes consistent with the module's forward:
    #   seg_score: [N=2, C=4, H=16, W_in=16]  (NCHW)
    #   labels:    [N=2, W_out=32]            (only last dim used for target size)
    seg_score = jax.random.normal(k1, (2, 4, 16, 16), dtype=jnp.float32)
    labels = jax.random.randint(k2, (2, 32), 0, 4).astype(jnp.int32)
    mask = jnp.ones((2, 32), dtype=jnp.float32)

    out = interplote_align_head_forward(seg_score, labels, mask)
    out = jax.block_until_ready(out)
    assert out.shape == (2, 4, 16, 32), out.shape
    assert out.dtype == seg_score.dtype

    # Independent reference: direct 2-tap linear interpolation along W, matching
    # F.interpolate(mode='bilinear', align_corners=False) with H unchanged.
    N, C, H, W_in = seg_score.shape
    W_out = int(labels.shape[-1])
    j = jnp.arange(W_out, dtype=jnp.float32)
    src = jnp.maximum((j + 0.5) * (W_in / W_out) - 0.5, 0.0)
    x0 = jnp.minimum(jnp.floor(src).astype(jnp.int32), W_in - 1)
    x1 = jnp.minimum(x0 + 1, W_in - 1)
    lam = src - x0.astype(jnp.float32)
    ref = seg_score[..., x0] * (1.0 - lam) + seg_score[..., x1] * lam
    assert jnp.allclose(out, ref, atol=1e-5, rtol=1e-5), float(jnp.max(jnp.abs(out - ref)))

    print("KERNEL_OK")
</pallas_src>

<mosaic_0001>
module attributes {stable_mosaic.version = 11 : i64} {
  func.func @_interp_matmul_kernel(%arg0: i32, %arg1: memref<8x128xf32, #tpu.memory_space<vmem>>, %arg2: memref<128x256xf32, #tpu.memory_space<vmem>>, %arg3: memref<8x256xf32, #tpu.memory_space<vmem>>) attributes {dimension_semantics = [#tpu.dimension_semantics<parallel>], iteration_bounds = array<i64: 2>, scalar_prefetch = 0 : i64, scratch_operands = 0 : i64, tpu.core_type = #tpu.core_type<tc>, window_params = [{transform_indices = @transform_0, window_bounds = array<i64: 8, 128>}, {pipeline_mode = #tpu.pipeline_mode<synchronous>, transform_indices = @transform_1, window_bounds = array<i64: 128, 256>}, {transform_indices = @transform_2, window_bounds = array<i64: 8, 256>}]} {
    %c0 = arith.constant 0 : index
    %c0_0 = arith.constant 0 : index
    %0 = vector.load %arg1[%c0, %c0_0] : memref<8x128xf32, #tpu.memory_space<vmem>>, vector<8x128xf32>
    %c0_1 = arith.constant 0 : index
    %c0_2 = arith.constant 0 : index
    %1 = vector.load %arg2[%c0_1, %c0_2] : memref<128x256xf32, #tpu.memory_space<vmem>>, vector<128x256xf32>
    %cst = arith.constant dense<0.000000e+00> : vector<8x256xf32>
    %2 = tpu.matmul %0, %1, %cst {dimension_numbers = #tpu.dot_dimension_numbers<[1], [0], [0], [1], [0, 0, 1, 1], [], []>} : vector<8x128xf32>, vector<128x256xf32>, vector<8x256xf32> -> vector<8x256xf32>
    %c0_3 = arith.constant 0 : index
    %c0_4 = arith.constant 0 : index
    %3 = vector.load %arg3[%c0_3, %c0_4] : memref<8x256xf32, #tpu.memory_space<vmem>>, vector<8x256xf32>
    tpu.vector_store %arg3[%c0_3, %c0_4], %2 {strides = array<i32>} : memref<8x256xf32, #tpu.memory_space<vmem>>, vector<8x256xf32>,
    return
  }
  func.func @transform_0(%arg0: i32) -> (i32, i32) {
    %c0_i32 = arith.constant 0 : i32
    %c0_i32_0 = arith.constant 0 : i32
    return %arg0, %c0_i32 : i32, i32
  }
  func.func @transform_1(%arg0: i32) -> (i32, i32) {
    %c0_i32 = arith.constant 0 : i32
    %c0_i32_0 = arith.constant 0 : i32
    %c0_i32_1 = arith.constant 0 : i32
    return %c0_i32, %c0_i32_0 : i32, i32
  }
  func.func @transform_2(%arg0: i32) -> (i32, i32) {
    %c0_i32 = arith.constant 0 : i32
    %c0_i32_0 = arith.constant 0 : i32
    return %arg0, %c0_i32 : i32, i32
  }
}

</mosaic_0001>

<bundles_post_ra>
// kernel: tpu_custom_call.1
= control target key start
LH: loop header
LB: loop body
LE: loop exit
PB: predicated region body
PF: predicated region fallthrough
CT: control target
= control target key end

     0   :  { %7 = vsyncpa [#allocation3], 0  ;;  %s834_s0 = inlined_call_operand.hbm [shape: f32[16,128], index: 0, kind: input, shape index: {}]   ;;  %s835_s1 = inlined_call_operand.hbm [shape: f32[128,256], index: 1, kind: input, shape index: {}]   ;;  %s836_s2 = inlined_call_operand.hbm [shape: f32[16,256], index: 2, kind: output, shape index: {}]  }
   0x1   :  { %9 = vsyncpa [#allocation3 + $0x1], 0 }
   0x2   :  { %10 = vsyncpa [#allocation6], 0 }
   0x3   :  { %11 = vsyncpa [#allocation4], 0 }
   0x4   :  { %13 = vsyncpa [#allocation4 + $0x1], 0  ;;  %s634_s9 = smov 0   ;;  %s636_s10 = smov 0  }
   0x5   :  { %s638_s11 = smov 0   ;;  %s640_s12 = smov 0  }
   0x6 LB: > { %s655_s13 = sadd.s32 4294967295, %s611_s12   ;;  %s375_s14 = sadd.s32 4294967294, %s611_s12   ;;  %s611_s12 = sphi %s640_s12, %s856_s12   ;;  %s607_s11 = sphi %s638_s11, %s855_s11   ;;  %s603_s10 = sphi %s636_s10, %s854_s10   ;;  %s599_s9 = sphi %s634_s9, %s853_s9  }
   0x7   : > { %p39_p0 = scmp.ne.s32.totalorder %s603_s10, %s599_s9  ;;  %p837_p1 = scmp.eq.s32.totalorder %s655_s13, 0 }
   0x8   : > { %p90_p3 = scmp.eq.s32.totalorder %s375_s14, 1  ;;  %p376_p5 = scmp.ge.s32.totalorder %s611_s12, 1 }
   0x9   : > { %p664_p4 = por %p837_p1, %p39_p0  ;;  %p97_p7 = scmp.lt.s32.totalorder %s611_s12, 3 }
   0xa   : > { %p669_p6 = por %p90_p3, %p39_p0  ;;  %s613_s18 = smov [#allocation5]  }
   0xb   : > { %s840_s15 = scalar_select %p664_p4, 1, 0 }
   0xc   : > { %s841_s16 = scalar_select %p669_p6, 1, 0 }
   0xd   : > { %p674_p8 = pnand %p376_p5, %p97_p7  ;;  %s109_s19 = sshll.u32 %s613_s18, 4  ;;  %s678_s19 = int_to_ptr.vmem [resolvable:$true] %s109_s19 }
   0xe   : > { %s690_s21 = sadd.s32 1, %s611_s12   ;;  %s26_s22 = sadd.s32 1, %s607_s11 }
   0xf   : > { %s842_s17 = scalar_select %p674_p8, 1, 0 }
  0x10   : > { %p431_p9 = pneg %p674_p8  ;;  %s23_s23 = ssub.s32 %s611_s12, %s690_s21 }
  0x11   : > { %s483_s26 = scalar_lea.hbm %s835_s1, 4096 }
  0x12   : > { %p685_p11 = pnand %p431_p9, %p837_p1  ;;  %p484_p12 = scmp.ne.s32.totalorder %s835_s1, %s483_s26 }
  0x13   : > { %p490_p5 = scmp.lt.u32.totalorder %s483_s26, %s835_s1 }
  0x14   : > { %p485_p13 = pneg %p685_p11 }
  0x16   : > { %p486_p0 = pnand %p485_p13, %p484_p12 }
  0x18   : > { %p487_p3 = pneg %p486_p0 }
  0x1a   : > { %p492_p7 = pnand %p490_p5, %p487_p3 }
  0x1c   : > { %495 = shalt.err (!%p492_p7)
}
  0x1d   : > { %s496_s3 = scalar_lea.vmem %s678_s19, 4096  ;;  %p504_p2 = scmp.lt.s32.totalorder %s678_s19, %s678_s19 }
  0x1e   : > { %p497_p9 = scmp.ne.s32.totalorder %s678_s19, %s496_s3  ;;  %p505_p6 = scmp.lt.s32.totalorder %s496_s3, %s496_s3 }
  0x20   : > { %p499_p10 = pnand %p497_p9, %p485_p13  ;;  %p506_p4 = por %p505_p6, %p504_p2 }
  0x22   : > { %p500_p1 = pneg %p499_p10 }
  0x24   : > { %p507_p8 = pnand %p506_p4, %p500_p1 }
  0x26   : > { %510 = shalt.err (!%p507_p8)
}
  0x27   : > { %s614_s4 = smov 256   ;;  %s615_s5 = smov 16  }
  0x28   : > { %434 = dma.hbm_to_vmem [thread:$0]  (!%p685_p11), %s835_s1, 4096, %s678_s19, [#allocation6], %s614_s4, %s614_s4, %s615_s5  }
  0x29   : > { %p24_p2 = scmp.eq.s32.totalorder %s23_s23, 0  ;;  %p33_p1 = scmp.ne.s32.totalorder %s607_s11, %s603_s10 }
  0x2a   : > { %p34_p4 = scmp.eq.s32.totalorder %s611_s12, 0  ;;  %p444_p6 = scmp.lt.s32.totalorder %s611_s12, 2 }
  0x2b   : > { %s721_s8 = scalar_select %p24_p2, %s607_s11, %s26_s22  }
  0x2c   : > { %p35_p8 = por %p34_p4, %p33_p1  ;;  %p844_p10 = scmp.eq.s32.totalorder %s655_s13, 1 }
  0x2d   : > { %s123_s18 = sand.u32 1, %s607_s11   ;;  %s380_s24 = sshll.u32 %s611_s12, 7 }
  0x2e   : > { %p725_p12 = por %p844_p10, %p33_p1  ;;  %s379_s25 = sshll.u32 %s123_s18, 3 }
  0x2f   : > { %s734_s27 = scalar_lea.hbm %s834_s0, %s380_s24  ;;  %s127_s19 = scalar_lea.vmem [#allocation2], %s379_s25 }
  0x30   : > { %s134_s22 = sshll.u32 %s127_s19, 4  ;;  %p736_p11 = pnand %p444_p6, %p35_p8  ;;  %s740_s22 = int_to_ptr.vmem [resolvable:$true] %s134_s22 }
  0x31   : > { %s124_s28 = scalar_lea.sflag [#allocation3], %s123_s18  ;;  %s511_s29 = scalar_lea.hbm %s734_s27, 128 }
  0x32   : > { %p512_p13 = scmp.ne.s32.totalorder %s734_s27, %s511_s29  ;;  %p513_p0 = pneg %p736_p11 }
  0x33   : > { %s516_s4 = scalar_lea.hbm %s834_s0, 256  ;;  %p517_p7 = scmp.lt.u32.totalorder %s734_s27, %s834_s0 }
  0x34   : > { %p514_p3 = pnand %p513_p0, %p512_p13  ;;  %p518_p9 = scmp.lt.u32.totalorder %s516_s4, %s511_s29 }
  0x35   : > { %p520_p1 = scmp.lt.u32.totalorder %s511_s29, %s734_s27 }
  0x36   : > { %p515_p5 = pneg %p514_p3  ;;  %p519_p2 = por %p518_p9, %p517_p7 }
  0x38   : > { %p521_p4 = por %p520_p1, %p519_p2 }
  0x3a   : > { %p522_p6 = pnand %p521_p4, %p515_p5 }
  0x3c   : > { %525 = shalt.err (!%p522_p6)
}
  0x3d   : > { %s526_s7 = scalar_lea.vmem %s740_s22, 128  ;;  %s616_s18 = smov [#allocation2]  }
  0x3e   : > { %p527_p8 = scmp.ne.s32.totalorder %s740_s22, %s526_s7  ;;  %s531_s24 = sshll.u32 %s616_s18, 4  ;;  %s532_s24 = int_to_ptr.vmem [resolvable:$false] %s531_s24 }
  0x3f   : > { %s533_s25 = scalar_lea.vmem %s532_s24, 256  ;;  %p534_p3 = scmp.lt.s32.totalorder %s740_s22, %s532_s24 }
  0x40   : > { %p529_p10 = pnand %p527_p8, %p513_p0  ;;  %p535_p7 = scmp.lt.s32.totalorder %s533_s25, %s526_s7 }
  0x42   : > { %p530_p13 = pneg %p529_p10  ;;  %p536_p9 = por %p535_p7, %p534_p3 }
  0x44   : > { %p537_p2 = pnand %p536_p9, %p530_p13 }
  0x46   : > { %540 = shalt.err (!%p537_p2)
}
  0x47   : > { %438 = dma.hbm_to_vmem [thread:$0]  (!%p736_p11), %s734_s27, 128, %s740_s22, %s124_s28  }
  0x48   : > { %p847_p5 = scmp.ne.s32.totalorder %s842_s17, 0 }
  0x49   : > { %s770_s20 = sand.u32 (!%p847_p5), 1, %s603_s10   ;;  %p848_p0 = scmp.ne.s32.totalorder (!%p847_p5), %s840_s15, 0 }
  0x4a   : > { %143 = sbr.rel (%p847_p5) target bundleno = 347 (0x15b), region = 28  ;;  %s382_s26 = sshll.u32 (!%p847_p5), %s770_s20, 3 }
  0x4b   : > { %s146_s19 = scalar_lea.sflag (!%p847_p5), [#allocation3], %s770_s20  ;;  %s774_s29 = scalar_lea.vmem (!%p847_p5), [#allocation2], %s382_s26 }
  0x51   : > { %586 = dma.done.wait (%p848_p0), %s146_s19, 128  }
  0x52   : > { %588 = vsyncadd (%p848_p0), %s146_s19, 4294967168  ;;  %p849_p11 = scmp.eq.s32.totalorder %s655_s13, 0 }
  0x54   : > { %590 = dma.done.wait (%p849_p11), [#allocation6], 4096   ;;  %p850_p1 = pmov %p849_p11 }
  0x55   : > { %v617_v0 = vmov 0.0   ;;  %v176_v1 = vld [vmem:[#allocation5 + $0x8] sm:$0xff]  ;;  %v178_v2 = vld [vmem:[#allocation5 + $0x18] sm:$0xff]  ;;  %v175_v3 = vld [vmem:[#allocation5] sm:$0xff]  ;;  %s384_s15 = sshll.u32 %s770_s20, 4  ;;  %s390_s22 = sshll.u32 %s655_s13, 8 }
  0x56   : > { %592 = vsyncadd (%p850_p1), [#allocation6], 4294963200  ;;  %271 = vmatprep.mubr.f32.mxu0 %v617_v0  ;;  %v391_v4 = vpack.c.bf16 %v178_v2, %v176_v1  ;;  %v177_v5 = vld [vmem:[#allocation5 + $0x10] sm:$0xff]  ;;  %v180_v6 = vld [vmem:[#allocation5 + $0x28] sm:$0xff]  ;;  %s173_s17 = scalar_lea.vmem [#allocation7], %s384_s15  ;;  %s792_s30 = scalar_lea.hbm %s836_s2, %s390_s22 }
  0x57   : > { %v182_v7 = vld [vmem:[#allocation5 + $0x38] sm:$0xff]  ;;  %v393_v8 = vpack.c.bf16 %v177_v5, %v175_v3  ;;  %v179_v10 = vld [vmem:[#allocation5 + $0x20] sm:$0xff]  ;;  %v181_v11 = vld [vmem:[#allocation5 + $0x30] sm:$0xff]  ;;  %s295_s27 = sshll.u32 %s173_s17, 4  ;;  %s281_s3 = scalar_lea.sflag [#allocation4], %s770_s20  ;;  %s787_s27 = int_to_ptr.vmem [resolvable:$true] %s295_s27 }
  0x58   : > { %v395_v9 = vpack.c.bf16 %v182_v7, %v180_v6  ;;  %v184_v12 = vld [vmem:[#allocation5 + $0x48] sm:$0xff]  ;;  %392 = vmatprep.subr.bf16.mxu0 %v391_v4  ;;  %v186_v13 = vld [vmem:[#allocation5 + $0x58] sm:$0xff]  ;;  %v397_v14 = vpack.c.bf16 %v181_v11, %v179_v10  ;;  %v183_v16 = vld [vmem:[#allocation5 + $0x40] sm:$0xff]  ;;  %s541_s4 = scalar_lea.vmem %s787_s27, 256  ;;  %s618_s13 = smov [#allocation7]  }
  0x59   : > { %394 = vmatpush1.bf16.msra.mxu0 %v393_v8  ;;  %v399_v15 = vpack.c.bf16 %v186_v13, %v184_v12  ;;  %v185_v17 = vld [vmem:[#allocation5 + $0x50] sm:$0xff]  ;;  %v188_v18 = vld [vmem:[#allocation5 + $0x68] sm:$0xff]  ;;  %v190_v19 = vld [vmem:[#allocation5 + $0x78] sm:$0xff]  ;;  %p542_p4 = scmp.ne.s32.totalorder %s787_s27, %s541_s4  ;;  %s545_s5 = sshll.u32 %s618_s13, 4  ;;  %s546_s5 = int_to_ptr.vmem [resolvable:$false] %s545_s5 }
  0x5a   : > { %396 = vmatprep.subr.bf16.mxu0 %v395_v9  ;;  %v401_v20 = vpack.c.bf16 %v185_v17, %v183_v16  ;;  %v403_v21 = vpack.c.bf16 %v190_v19, %v188_v18  ;;  %v187_v22 = vld [vmem:[#allocation5 + $0x60] sm:$0xff]  ;;  %v189_v23 = vld [vmem:[#allocation5 + $0x70] sm:$0xff]  ;;  %v192_v24 = vld [vmem:[#allocation5 + $0x88] sm:$0xff]  ;;  %s547_s6 = scalar_lea.vmem %s546_s5, 512  ;;  %p548_p10 = scmp.lt.s32.totalorder %s787_s27, %s546_s5 }
  0x5b   : > { %v194_v25 = vld [vmem:[#allocation5 + $0x98] sm:$0xff]  ;;  %v405_v26 = vpack.c.bf16 %v189_v23, %v187_v22  ;;  %v191_v28 = vld [vmem:[#allocation5 + $0x80] sm:$0xff]  ;;  %v193_v29 = vld [vmem:[#allocation5 + $0x90] sm:$0xff]  ;;  %p543_p6 = pnand %p542_p4, %p725_p12  ;;  %p549_p13 = scmp.lt.s32.totalorder %s547_s6, %s541_s4 }
  0x5c   : > { %v407_v27 = vpack.c.bf16 %v194_v25, %v192_v24  ;;  %v196_v30 = vld [vmem:[#allocation5 + $0xa8] sm:$0xff]  ;;  %v198_v31 = vld [vmem:[#allocation5 + $0xb8] sm:$0xff]  ;;  %v409_v32 = vpack.c.bf16 %v193_v29, %v191_v28  ;;  %v195_v34 = vld [vmem:[#allocation5 + $0xa0] sm:$0xff] }
  0x5d   : > { %398 = vmatpush1.bf16.msra.mxu0 %v397_v14  ;;  %v411_v33 = vpack.c.bf16 %v198_v31, %v196_v30  ;;  %v197_v35 = vld [vmem:[#allocation5 + $0xb0] sm:$0xff]  ;;  %v200_v36 = vld [vmem:[#allocation5 + $0xc8] sm:$0xff]  ;;  %v202_v37 = vld [vmem:[#allocation5 + $0xd8] sm:$0xff]  ;;  %p544_p8 = pneg %p543_p6  ;;  %p550_p3 = por %p549_p13, %p548_p10 }
  0x5e   : > { %400 = vmatprep.subr.bf16.mxu0 %v399_v15  ;;  %v413_v38 = vpack.c.bf16 %v197_v35, %v195_v34  ;;  %v415_v39 = vpack.c.bf16 %v202_v37, %v200_v36  ;;  %v199_v40 = vld [vmem:[#allocation5 + $0xc0] sm:$0xff]  ;;  %v201_v41 = vld [vmem:[#allocation5 + $0xd0] sm:$0xff]  ;;  %v204_v42 = vld [vmem:[#allocation5 + $0xe8] sm:$0xff] }
  0x5f   : > { %v206_v43 = vld [vmem:[#allocation5 + $0xf8] sm:$0xff]  ;;  %v417_v44 = vpack.c.bf16 %v201_v41, %v199_v40  ;;  %v203_v46 = vld [vmem:[#allocation5 + $0xe0] sm:$0xff]  ;;  %v205_v47 = vld [vmem:[#allocation5 + $0xf0] sm:$0xff]  ;;  %p551_p7 = pnand %p550_p3, %p544_p8 }
  0x60   : > { %v419_v45 = vpack.c.bf16 %v206_v43, %v204_v42  ;;  %v421_v48 = vpack.c.bf16 %v205_v47, %v203_v46  ;;  %v174_v49 = vld [vmem:[%s774_s29] sm:$0xff] }
  0x61   : > { %402 = vmatpush1.bf16.msra.mxu0 %v401_v20 }
  0x62   : > { %404 = vmatprep.subr.bf16.mxu0 %v403_v21 }
  0x65   : > { %406 = vmatpush1.bf16.msra.mxu0 %v405_v26 }
  0x66   : > { %408 = vmatprep.subr.bf16.mxu0 %v407_v27 }
  0x69   : > { %410 = vmatpush1.bf16.msra.mxu0 %v409_v32 }
  0x6a   : > { %412 = vmatprep.subr.bf16.mxu0 %v411_v33 }
  0x6d   : > { %414 = vmatpush1.bf16.msra.mxu0 %v413_v38 }
  0x6e   : > { %416 = vmatprep.subr.bf16.mxu0 %v415_v39 }
  0x71   : > { %418 = vmatpush1.bf16.msra.mxu0 %v417_v44 }
  0x72   : > { %420 = vmatprep.subr.bf16.mxu0 %v419_v45 }
  0x75   : > { %422 = vmatpush1.bf16.msra.mxu0 %v421_v48 }
  0x78   : > { %272 = vmatmul.mubr.f32.vlgmr.msra.gmra.mrb[0].mxu0 %v174_v49 }
 0x14b   : > { %v273_v50 = vpop.f32.mrb[0].mxu0 }
 0x14c   : > { %278 = vst [vmem:[%s173_s17] sm:$0xff] %v273_v50  ;;  %v275_v51 = vpop.f32.mrb[1].mxu0 }
 0x14d   : > { %279 = vst [vmem:[%s173_s17 + $0x8] sm:$0xff] %v275_v51 }
 0x14e   : > { %554 = shalt.err (!%p551_p7)
}
 0x14f   : > { %s555_s7 = scalar_lea.hbm %s792_s30, 256  ;;  %s559_s25 = scalar_lea.hbm %s836_s2, 512 }
 0x150   : > { %p556_p9 = scmp.ne.s32.totalorder %s792_s30, %s555_s7  ;;  %p560_p0 = scmp.lt.u32.totalorder %s792_s30, %s836_s2 }
 0x151   : > { %p561_p11 = scmp.lt.u32.totalorder %s559_s25, %s555_s7  ;;  %p563_p4 = scmp.lt.u32.totalorder %s555_s7, %s792_s30 }
 0x152   : > { %p557_p2 = pnand %p556_p9, %p725_p12 }
 0x153   : > { %p562_p1 = por %p561_p11, %p560_p0 }
 0x154   : > { %p558_p5 = pneg %p557_p2 }
 0x155   : > { %p564_p6 = por %p563_p4, %p562_p1 }
 0x157   : > { %p565_p8 = pnand %p564_p6, %p558_p5 }
 0x159   : > { %568 = shalt.err (!%p565_p8)
}
 0x15a   : > { %429 = dma.vmem_to_hbm [thread:$0]  (%p725_p12), %s787_s27, 256, %s792_s30, %s281_s3  }
 0x15b PF: > { %s307_s19 = sand.u32 1, %s599_s9   ;;  %p851_p10 = scmp.ne.s32.totalorder %s841_s16, 0 }
 0x15c   : > { %p852_p13 = scmp.ge.s32.totalorder %s611_s12, 2  ;;  %s308_s29 = scalar_lea.sflag [#allocation4], %s307_s19 }
 0x15e   : > { %p440_p3 = pnand %p852_p13, %p851_p10 }
 0x160   : > { %594 = dma.done.wait (!%p440_p3), %s308_s29, 256  }
 0x161   : > { %596 = vsyncadd (!%p440_p3), %s308_s29, 4294967040  ;;  %p16_p7 = scmp.ge.s32.totalorder %s690_s21, 4   ;;  %s853_s9 = smov %s603_s10 }
 0x162   : > { %s854_s10 = smov %s607_s11  ;;  %s855_s11 = smov %s721_s8 }
 0x163   : > { %s856_s12 = smov %s690_s21  ;;  %18 = sbr.rel (!%p16_p7) target bundleno = 6 (0x6), region = 77 }
 0x16a   :  { %313 = vsyncpa [#allocation3], 1 }
 0x16b   :  { %315 = vsyncpa [#allocation3 + $0x1], 1 }
 0x16c   :  { %316 = vsyncpa [#allocation6], 1 }
 0x16d   :  { %317 = vsyncpa [#allocation4], 1 }
 0x16e   :  { %319 = vsyncpa [#allocation4 + $0x1], 1 }

</bundles_post_ra>
